<compile_context>
chip_gen: v7x
topology: tpu7x:2x2x1
jax: 0.10.0
libtpu: 0.0.40
codegen_flags: <defaults>
</compile_context>

<pallas_src>
import jax
import jax.numpy as jnp
from jax.experimental import pallas as pl
from jax.experimental.pallas import tpu as pltpu

IN_FEATURES = 3
H1 = 128
H2 = 64
OUT_FEATURES = 2

K_PAD = 16     # input features padded 3 -> 16 (bf16 sublane tile for w1)
H_PAD = 128    # hidden lane width (H1 = 128 exactly; H2 = 64 zero-padded)
OUT_PAD = 8    # logits padded 2 -> 8 (f32 sublane tile); sliced in wrapper


# ----------------------------- Pallas kernel -----------------------------

def _mlp_kernel(x_ref, w1_ref, b1_ref, w2_ref, b2_ref, w3_ref, b3_ref, o_ref):
    # fc1 -> relu -> fc2 -> relu -> fc3, fully VMEM/vreg resident.
    # bf16 MXU operands, f32 accumulation, f32 bias/ReLU epilogue.
    h = jnp.dot(x_ref[...], w1_ref[...], preferred_element_type=jnp.float32)
    h = jnp.maximum(h + b1_ref[...], 0.0)
    h = jnp.dot(h.astype(jnp.bfloat16), w2_ref[...],
                preferred_element_type=jnp.float32)
    h = jnp.maximum(h + b2_ref[...], 0.0)
    y = jnp.dot(h.astype(jnp.bfloat16), w3_ref[...],
                preferred_element_type=jnp.float32)
    o_ref[...] = y + b3_ref[...]


# ----------------------------- helpers -----------------------------

def _round_up(x, m):
    return (x + m - 1) // m * m


def _choose_batch_tiling(n):
    """Return (bm, n_pad) with bm | n_pad and bm a multiple of 16.

    Small batches: one tile covering the whole (16-aligned) batch.
    Large batches: big tiles (512/1024 rows) to amortize the ~0.35us per-grid-
    step overhead, and >=2 programs so v7x can use both TensorCores. Per-tile
    VMEM (x tile + out tile + ~3 live f32 (bm,128) intermediates, double-
    buffered I/O) is ~2 MiB at bm=1024 -- well under the 32 MiB default scoped
    VMEM on v5e/v6e/v7x, so no vmem_limit_bytes override is needed.
    """
    n16 = _round_up(max(n, 16), 16)
    if n16 <= 512:
        return n16, n16
    bm = 512 if n16 <= 4096 else 1024
    return bm, _round_up(n16, bm)


def _pad2d(a, rows, cols, dtype):
    r, c = a.shape
    return jnp.pad(a.astype(dtype), ((0, rows - r), (0, cols - c)))


def prepare_params(raw):
    """Pad / transpose PyTorch-layout weights into MXU-friendly bf16 mats."""
    w1, b1 = raw["fc1_w"], raw["fc1_b"]      # (128, 3), (128,)
    w2, b2 = raw["fc2_w"], raw["fc2_b"]      # (64, 128), (64,)
    w3, b3 = raw["fc3_w"], raw["fc3_b"]      # (2, 64),  (2,)
    return {
        # x @ W.T  ->  store W.T, zero-padded.
        "w1p": _pad2d(w1.T, K_PAD, H_PAD, jnp.bfloat16),     # (16, 128)
        "w2p": _pad2d(w2.T, H_PAD, H_PAD, jnp.bfloat16),     # (128, 128)
        "w3p": _pad2d(w3.T, H_PAD, OUT_PAD, jnp.bfloat16),   # (128, 8)
        "b1p": jnp.pad(b1.astype(jnp.float32),
                       (0, H_PAD - H1)).reshape(1, H_PAD),
        "b2p": jnp.pad(b2.astype(jnp.float32),
                       (0, H_PAD - H2)).reshape(1, H_PAD),
        "b3p": jnp.pad(b3.astype(jnp.float32),
                       (0, OUT_PAD - OUT_FEATURES)).reshape(1, OUT_PAD),
    }


def binary_classifier_forward(params, x):
    """x: (N, 3) float32 -> logits (N, 2) float32."""
    n, d_in = x.shape
    bm, n_pad = _choose_batch_tiling(n)

    # Narrow pad: (n_pad, 16) bf16.  Padded columns hit zero rows of w1p and
    # padded rows are sliced away, so padding never changes the valid result.
    xp = jnp.zeros((n_pad, K_PAD), jnp.bfloat16)
    xp = xp.at[:n, :d_in].set(x.astype(jnp.bfloat16))

    grid = (n_pad // bm,)

    out = pl.pallas_call(
        _mlp_kernel,
        out_shape=jax.ShapeDtypeStruct((n_pad, OUT_PAD), jnp.float32),
        grid=grid,
        in_specs=[
            pl.BlockSpec((bm, K_PAD), lambda i: (i, 0)),       # x tile
            pl.BlockSpec((K_PAD, H_PAD), lambda i: (0, 0)),    # w1
            pl.BlockSpec((1, H_PAD), lambda i: (0, 0)),        # b1
            pl.BlockSpec((H_PAD, H_PAD), lambda i: (0, 0)),    # w2
            pl.BlockSpec((1, H_PAD), lambda i: (0, 0)),        # b2
            pl.BlockSpec((H_PAD, OUT_PAD), lambda i: (0, 0)),  # w3
            pl.BlockSpec((1, OUT_PAD), lambda i: (0, 0)),      # b3
        ],
        out_specs=pl.BlockSpec((bm, OUT_PAD), lambda i: (i, 0)),
        compiler_params=pltpu.CompilerParams(
            dimension_semantics=("parallel",)),
    )(xp, params["w1p"], params["b1p"], params["w2p"], params["b2p"],
      params["w3p"], params["b3p"])

    return out[:n, :OUT_FEATURES]


# ----------------------------- reference & init -----------------------------

def reference_forward(raw, x):
    h = jnp.maximum(x @ raw["fc1_w"].T + raw["fc1_b"], 0.0)
    h = jnp.maximum(h @ raw["fc2_w"].T + raw["fc2_b"], 0.0)
    return h @ raw["fc3_w"].T + raw["fc3_b"]


def _linear_init(key, out_f, in_f):
    # PyTorch nn.Linear default: U(-1/sqrt(fan_in), 1/sqrt(fan_in))
    kw, kb = jax.random.split(key)
    bound = 1.0 / jnp.sqrt(jnp.float32(in_f))
    w = jax.random.uniform(kw, (out_f, in_f), jnp.float32, -bound, bound)
    b = jax.random.uniform(kb, (out_f,), jnp.float32, -bound, bound)
    return w, b


def init_raw_params(key):
    k1, k2, k3 = jax.random.split(key, 3)
    w1, b1 = _linear_init(k1, H1, IN_FEATURES)
    w2, b2 = _linear_init(k2, H2, H1)
    w3, b3 = _linear_init(k3, OUT_FEATURES, H2)
    return {"fc1_w": w1, "fc1_b": b1,
            "fc2_w": w2, "fc2_b": b2,
            "fc3_w": w3, "fc3_b": b3}


# ----------------------------- main -----------------------------

if __name__ == "__main__":
    key = jax.random.PRNGKey(0)
    raw = init_raw_params(jax.random.fold_in(key, 1))
    params = prepare_params(raw)

    x = jax.random.normal(jax.random.fold_in(key, 2), (4, IN_FEATURES),
                          jnp.float32)

    fwd = jax.jit(binary_classifier_forward)
    out = fwd(params, x)
    jax.block_until_ready(out)

    assert out.shape == (4, OUT_FEATURES) and out.dtype == jnp.float32
    assert bool(jnp.all(jnp.isfinite(out)))

    # bf16 MXU operands -> ~1e-2-level agreement with the f32 reference.
    ref = reference_forward(raw, x)
    assert bool(jnp.allclose(out, ref, atol=5e-2, rtol=5e-2))

    print("KERNEL_OK")
</pallas_src>

<mosaic_0001>
module attributes {stable_mosaic.version = 11 : i64} {
  func.func @_mlp_kernel(%arg0: i32, %arg1: memref<16x16xbf16, #tpu.memory_space<vmem>>, %arg2: memref<16x128xbf16, #tpu.memory_space<vmem>>, %arg3: memref<1x128xf32, #tpu.memory_space<vmem>>, %arg4: memref<128x128xbf16, #tpu.memory_space<vmem>>, %arg5: memref<1x128xf32, #tpu.memory_space<vmem>>, %arg6: memref<128x8xbf16, #tpu.memory_space<vmem>>, %arg7: memref<1x8xf32, #tpu.memory_space<vmem>>, %arg8: memref<16x8xf32, #tpu.memory_space<vmem>>) attributes {dimension_semantics = [#tpu.dimension_semantics<parallel>], iteration_bounds = array<i64: 1>, scalar_prefetch = 0 : i64, scratch_operands = 0 : i64, tpu.core_type = #tpu.core_type<tc>, window_params = [{transform_indices = @transform_0, window_bounds = array<i64: 16, 16>}, {pipeline_mode = #tpu.pipeline_mode<synchronous>, transform_indices = @transform_1, window_bounds = array<i64: 16, 128>}, {pipeline_mode = #tpu.pipeline_mode<synchronous>, transform_indices = @transform_2, window_bounds = array<i64: 1, 128>}, {pipeline_mode = #tpu.pipeline_mode<synchronous>, transform_indices = @transform_3, window_bounds = array<i64: 128, 128>}, {pipeline_mode = #tpu.pipeline_mode<synchronous>, transform_indices = @transform_4, window_bounds = array<i64: 1, 128>}, {pipeline_mode = #tpu.pipeline_mode<synchronous>, transform_indices = @transform_5, window_bounds = array<i64: 128, 8>}, {pipeline_mode = #tpu.pipeline_mode<synchronous>, transform_indices = @transform_6, window_bounds = array<i64: 1, 8>}, {transform_indices = @transform_7, window_bounds = array<i64: 16, 8>}]} {
    %c0 = arith.constant 0 : index
    %c0_0 = arith.constant 0 : index
    %0 = vector.load %arg1[%c0, %c0_0] : memref<16x16xbf16, #tpu.memory_space<vmem>>, vector<16x16xbf16>
    %c0_1 = arith.constant 0 : index
    %c0_2 = arith.constant 0 : index
    %1 = vector.load %arg2[%c0_1, %c0_2] : memref<16x128xbf16, #tpu.memory_space<vmem>>, vector<16x128xbf16>
    %cst = arith.constant dense<0.000000e+00> : vector<16x128xf32>
    %2 = tpu.matmul %0, %1, %cst {dimension_numbers = #tpu.dot_dimension_numbers<[1], [0], [0], [1], [0, 0, 1, 1], [], []>} : vector<16x16xbf16>, vector<16x128xbf16>, vector<16x128xf32> -> vector<16x128xf32>
    %c0_3 = arith.constant 0 : index
    %c0_4 = arith.constant 0 : index
    %3 = vector.load %arg3[%c0_3, %c0_4] : memref<1x128xf32, #tpu.memory_space<vmem>>, vector<1x128xf32>
    %4 = vector.broadcast %3 : vector<1x128xf32> to vector<16x128xf32>
    %5 = arith.addf %2, %4 : vector<16x128xf32>
    %cst_5 = arith.constant 0.000000e+00 : f32
    %6 = vector.broadcast %cst_5 : f32 to vector<16x128xf32>
    %7 = arith.maximumf %5, %6 : vector<16x128xf32>
    %8 = arith.truncf %7 : vector<16x128xf32> to vector<16x128xbf16>
    %c0_6 = arith.constant 0 : index
    %c0_7 = arith.constant 0 : index
    %9 = vector.load %arg4[%c0_6, %c0_7] : memref<128x128xbf16, #tpu.memory_space<vmem>>, vector<128x128xbf16>
    %cst_8 = arith.constant dense<0.000000e+00> : vector<16x128xf32>
    %10 = tpu.matmul %8, %9, %cst_8 {dimension_numbers = #tpu.dot_dimension_numbers<[1], [0], [0], [1], [0, 0, 1, 1], [], []>} : vector<16x128xbf16>, vector<128x128xbf16>, vector<16x128xf32> -> vector<16x128xf32>
    %c0_9 = arith.constant 0 : index
    %c0_10 = arith.constant 0 : index
    %11 = vector.load %arg5[%c0_9, %c0_10] : memref<1x128xf32, #tpu.memory_space<vmem>>, vector<1x128xf32>
    %12 = vector.broadcast %11 : vector<1x128xf32> to vector<16x128xf32>
    %13 = arith.addf %10, %12 : vector<16x128xf32>
    %cst_11 = arith.constant 0.000000e+00 : f32
    %14 = vector.broadcast %cst_11 : f32 to vector<16x128xf32>
    %15 = arith.maximumf %13, %14 : vector<16x128xf32>
    %16 = arith.truncf %15 : vector<16x128xf32> to vector<16x128xbf16>
    %c0_12 = arith.constant 0 : index
    %c0_13 = arith.constant 0 : index
    %17 = vector.load %arg6[%c0_12, %c0_13] : memref<128x8xbf16, #tpu.memory_space<vmem>>, vector<128x8xbf16>
    %cst_14 = arith.constant dense<0.000000e+00> : vector<16x8xf32>
    %18 = tpu.matmul %16, %17, %cst_14 {dimension_numbers = #tpu.dot_dimension_numbers<[1], [0], [0], [1], [0, 0, 1, 1], [], []>} : vector<16x128xbf16>, vector<128x8xbf16>, vector<16x8xf32> -> vector<16x8xf32>
    %c0_15 = arith.constant 0 : index
    %c0_16 = arith.constant 0 : index
    %19 = vector.load %arg7[%c0_15, %c0_16] : memref<1x8xf32, #tpu.memory_space<vmem>>, vector<1x8xf32>
    %20 = vector.broadcast %19 : vector<1x8xf32> to vector<16x8xf32>
    %21 = arith.addf %18, %20 : vector<16x8xf32>
    %c0_17 = arith.constant 0 : index
    %c0_18 = arith.constant 0 : index
    %22 = vector.load %arg8[%c0_17, %c0_18] : memref<16x8xf32, #tpu.memory_space<vmem>>, vector<16x8xf32>
    tpu.vector_store %arg8[%c0_17, %c0_18], %21 {strides = array<i32>} : memref<16x8xf32, #tpu.memory_space<vmem>>, vector<16x8xf32>,
    return
  }
  func.func @transform_0(%arg0: i32) -> (i32, i32) {
    %c0_i32 = arith.constant 0 : i32
    %c0_i32_0 = arith.constant 0 : i32
    return %arg0, %c0_i32 : i32, i32
  }
  func.func @transform_1(%arg0: i32) -> (i32, i32) {
    %c0_i32 = arith.constant 0 : i32
    %c0_i32_0 = arith.constant 0 : i32
    %c0_i32_1 = arith.constant 0 : i32
    return %c0_i32, %c0_i32_0 : i32, i32
  }
  func.func @transform_2(%arg0: i32) -> (i32, i32) {
    %c0_i32 = arith.constant 0 : i32
    %c0_i32_0 = arith.constant 0 : i32
    %c0_i32_1 = arith.constant 0 : i32
    return %c0_i32, %c0_i32_0 : i32, i32
  }
  func.func @transform_3(%arg0: i32) -> (i32, i32) {
    %c0_i32 = arith.constant 0 : i32
    %c0_i32_0 = arith.constant 0 : i32
    %c0_i32_1 = arith.constant 0 : i32
    return %c0_i32, %c0_i32_0 : i32, i32
  }
  func.func @transform_4(%arg0: i32) -> (i32, i32) {
    %c0_i32 = arith.constant 0 : i32
    %c0_i32_0 = arith.constant 0 : i32
    %c0_i32_1 = arith.constant 0 : i32
    return %c0_i32, %c0_i32_0 : i32, i32
  }
  func.func @transform_5(%arg0: i32) -> (i32, i32) {
    %c0_i32 = arith.constant 0 : i32
    %c0_i32_0 = arith.constant 0 : i32
    %c0_i32_1 = arith.constant 0 : i32
    return %c0_i32, %c0_i32_0 : i32, i32
  }
  func.func @transform_6(%arg0: i32) -> (i32, i32) {
    %c0_i32 = arith.constant 0 : i32
    %c0_i32_0 = arith.constant 0 : i32
    %c0_i32_1 = arith.constant 0 : i32
    return %c0_i32, %c0_i32_0 : i32, i32
  }
  func.func @transform_7(%arg0: i32) -> (i32, i32) {
    %c0_i32 = arith.constant 0 : i32
    %c0_i32_0 = arith.constant 0 : i32
    return %arg0, %c0_i32 : i32, i32
  }
}

</mosaic_0001>

<bundles_post_ra>
// kernel: binary_classifier_forward.1
= control target key start
LH: loop header
LB: loop body
LE: loop exit
PB: predicated region body
PF: predicated region fallthrough
CT: control target
= control target key end

     0   :  { %v439_v0 = vmov 0.0   ;;  %vm440_vm0 = vmmov 0   ;;  %vm49_vm1 = vcmask 130048   ;;  %vm324_vm2 = vcmask 64512   ;;  %s570_s1 = inlined_call_operand.vmem [shape: bf16[16,128], index: 1, kind: input, shape index: {}]   ;;  %s571_s0 = inlined_call_operand.vmem [shape: bf16[16,16], index: 0, kind: input, shape index: {}]   ;;  %s572_s3 = inlined_call_operand.vmem [shape: bf16[128,128], index: 3, kind: input, shape index: {}]   ;;  %s573_s5 = inlined_call_operand.vmem [shape: bf16[128,8], index: 5, kind: input, shape index: {}]   ;;  %s574_s2 = inlined_call_operand.vmem [shape: f32[1,128], index: 2, kind: input, shape index: {}]   ;;  %s575_s4 = inlined_call_operand.vmem [shape: f32[1,128], index: 4, kind: input, shape index: {}]   ;;  %s576_s6 = inlined_call_operand.vmem [shape: f32[1,8], index: 6, kind: input, shape index: {}]   ;;  %s577_s7 = inlined_call_operand.vmem [shape: f32[16,8], index: 7, kind: output, shape index: {}]  }
   0x1   :  { %373 = vmatprep.subr.bf16.mxu0 %v439_v0  ;;  %v421_v1 = vld [vmem:[%s570_s1] sm:$0xff]   ;;  %375 = vmatprep.mubr.msk.bf16.mxu0 %vm440_vm0, %v439_v0  ;;  %v424_v4 = vld [vmem:[%s572_s3 + $0x8] sm:$0xff]   ;;  %v425_v5 = vld [vmem:[%s572_s3 + $0x10] sm:$0xff]  }
   0x2   :  { %v422_v2 = vld [vmem:[%s571_s0] sm:$0xff]   ;;  %379 = vmatprep.subr.bf16.mxu1 %v439_v0  ;;  %395 = vmatprep.mubr.msk.bf16.mxu1 %vm440_vm0, %v439_v0  ;;  %v426_v6 = vld [vmem:[%s572_s3 + $0x18] sm:$0xff]   ;;  %v428_v8 = vld [vmem:[%s572_s3 + $0x28] sm:$0xff]  }
   0x3   :  { %374 = vmatpush3.bf16.msra.mxu0 %v421_v1  ;;  %v423_v3 = vld [vmem:[%s572_s3] sm:$0xff]   ;;  %v429_v9 = vld [vmem:[%s572_s3 + $0x30] sm:$0xff]   ;;  %v430_v10 = vld [vmem:[%s572_s3 + $0x38] sm:$0xff]  }
   0x4   :  { %399 = vmatprep.subr.bf16.mxu0 %v439_v0  ;;  %380 = vmatpush3.bf16.msra.mxu1 %v423_v3  ;;  %v427_v7 = vld [vmem:[%s572_s3 + $0x20] sm:$0xff]   ;;  %v432_v12 = vld [vmem:[%s573_s5 + $0x8] sm:$0xff]   ;;  %v433_v13 = vld [vmem:[%s573_s5 + $0x10] sm:$0xff]  }
   0x5   :  { %381 = vmatprep.subr.bf16.mxu1 %v439_v0  ;;  %v431_v11 = vld [vmem:[%s573_s5] sm:$0xff]   ;;  %v434_v14 = vld [vmem:[%s573_s5 + $0x18] sm:$0xff]   ;;  %v436_v16 = vld [vmem:[%s573_s5 + $0x28] sm:$0xff]  }
   0x6   :  { %376 = vmatmul.mubr.msk.bf16.vlgmr.msra.gmra.mrb[0].mxu0 %vm49_vm1, %v422_v2  ;;  %v435_v15 = vld [vmem:[%s573_s5 + $0x20] sm:$0xff]   ;;  %v437_v27 = vld [vmem:[%s573_s5 + $0x30] sm:$0xff]   ;;  %v438_v28 = vld [vmem:[%s573_s5 + $0x38] sm:$0xff]  }
   0x7   :  { %415 = vmatprep.mubr.msk.bf16.mxu0 %vm440_vm0, %v439_v0  ;;  %400 = vmatpush3.bf16.msra.mxu0 %v431_v11  ;;  %v331_v17 = vld [vmem:[%s574_s2] ss:$0 sm:$0xff] }
   0x8   :  { %382 = vmatpush3.bf16.msra.mxu1 %v424_v4  ;;  %401 = vmatprep.subr.bf16.mxu0 %v439_v0  ;;  %v335_v29 = vld [vmem:[%s575_s4] ss:$0 sm:$0xff] }
   0x9   :  { %383 = vmatprep.subr.bf16.mxu1 %v439_v0  ;;  %v344_v39 = vld [vmem:[%s576_s6] ss:$0 sm:$0xff] }
   0xb   :  { %402 = vmatpush3.bf16.msra.mxu0 %v432_v12 }
   0xc   :  { %384 = vmatpush3.bf16.msra.mxu1 %v425_v5  ;;  %403 = vmatprep.subr.bf16.mxu0 %v439_v0 }
   0xd   :  { %385 = vmatprep.subr.bf16.mxu1 %v439_v0 }
   0xf   :  { %404 = vmatpush3.bf16.msra.mxu0 %v433_v13 }
  0x10   :  { %386 = vmatpush3.bf16.msra.mxu1 %v426_v6  ;;  %405 = vmatprep.subr.bf16.mxu0 %v439_v0 }
  0x11   :  { %387 = vmatprep.subr.bf16.mxu1 %v439_v0 }
  0x13   :  { %406 = vmatpush3.bf16.msra.mxu0 %v434_v14 }
  0x14   :  { %388 = vmatpush3.bf16.msra.mxu1 %v427_v7  ;;  %407 = vmatprep.subr.bf16.mxu0 %v439_v0 }
  0x15   :  { %389 = vmatprep.subr.bf16.mxu1 %v439_v0 }
  0x17   :  { %408 = vmatpush3.bf16.msra.mxu0 %v435_v15 }
  0x18   :  { %390 = vmatpush3.bf16.msra.mxu1 %v428_v8  ;;  %409 = vmatprep.subr.bf16.mxu0 %v439_v0 }
  0x19   :  { %391 = vmatprep.subr.bf16.mxu1 %v439_v0 }
  0x1b   :  { %410 = vmatpush3.bf16.msra.mxu0 %v436_v16 }
  0x1c   :  { %392 = vmatpush3.bf16.msra.mxu1 %v429_v9  ;;  %411 = vmatprep.subr.bf16.mxu0 %v439_v0 }
  0x1d   :  { %393 = vmatprep.subr.bf16.mxu1 %v439_v0 }
  0x1f   :  { %412 = vmatpush3.bf16.msra.mxu0 %v437_v27 }
  0x20   :  { %394 = vmatpush3.bf16.msra.mxu1 %v430_v10  ;;  %413 = vmatprep.subr.bf16.mxu0 %v439_v0 }
  0x23   :  { %414 = vmatpush3.bf16.msra.mxu0 %v438_v28 }
  0xd9   :  { %v87_v18 = vpop.f32.mrb[0].mxu0 }
  0xda   :  { %v88_v19 = vadd.f32 %v331_v17, %v87_v18  ;;  %v377_v20 = vpop.f32.mrb[1].mxu0 }
  0xdb   :  { %v90_v21 = vpop.f32.mrb[2].mxu0 }
  0xdc   :  { %v91_v22 = vadd.f32 %v331_v17, %v90_v21  ;;  %v378_v23 = vpop.f32.mrb[3].mxu0  ;;  %v94_v24 = vmax.f32 %v88_v19, 0.0 }
  0xde   :  { %v95_v25 = vmax.f32 %v91_v22, 0.0 }
  0xe0   :  { %v96_v26 = vpack.c.bf16 %v95_v25, %v94_v24 }
  0xe2   :  { %396 = vmatmul.mubr.bf16.vlgmr.msra.gmra.mrb[0].mxu1 %v96_v26 }
 0x1b5   :  { %v202_v30 = vpop.f32.mrb[0].mxu1 }
 0x1b6   :  { %v203_v31 = vadd.f32 %v335_v29, %v202_v30  ;;  %v397_v32 = vpop.f32.mrb[1].mxu1 }
 0x1b7   :  { %v205_v33 = vpop.f32.mrb[2].mxu1 }
 0x1b8   :  { %v206_v34 = vadd.f32 %v335_v29, %v205_v33  ;;  %v398_v35 = vpop.f32.mrb[3].mxu1  ;;  %v209_v36 = vmax.f32 %v203_v31, 0.0 }
 0x1ba   :  { %v210_v37 = vmax.f32 %v206_v34, 0.0 }
 0x1bc   :  { %v211_v38 = vpack.c.bf16 %v210_v37, %v209_v36 }
 0x1be   :  { %416 = vmatmul.mubr.bf16.vlgmr.msra.gmra.mrb[4].mxu0 %v211_v38 }
 0x291   :  { %v317_v40 = vpop.f32.mrb[4].mxu0 }
 0x292   :  { %v318_v41 = vadd.f32 %v344_v39, %v317_v40  ;;  %v417_v42 = vpop.f32.mrb[5].mxu0 }
 0x293   :  { %v320_v43 = vpop.f32.mrb[6].mxu0 }
 0x294   :  { %325 = vst.msk [vmem:[%s577_s7] sm:$0xff] %vm324_vm2, %v318_v41  ;;  %v321_v44 = vadd.f32 %v344_v39, %v320_v43  ;;  %v418_v45 = vpop.f32.mrb[7].mxu0 }
 0x296   :  { %326 = vst.msk [vmem:[%s577_s7 + $0x8] sm:$0xff] %vm324_vm2, %v321_v44 }

</bundles_post_ra>
